<compile_context>
chip_gen: v7x
topology: tpu7x:2x2x1
jax: 0.10.0
libtpu: 0.0.40
codegen_flags: <defaults>
</compile_context>

<pallas_src>
import functools

import jax
import jax.numpy as jnp
from jax.experimental import pallas as pl
from jax.experimental.pallas import tpu as pltpu


BN_EPS = 1e-5
NORM_EPS = 1e-10


def _round_up(x, m):
    return ((x + m - 1) // m) * m


def encoder_kernel(x_ref, w_ref, b_ref, mask_ref, out_ref, acc_ref):
    """One (batch-tile i, K-tile k) grid step.

    x_ref:    [TB, TK] f32   (cast to bf16 in-kernel, right before the MXU)
    w_ref:    [TK, NP] bf16  (BN folded in, mu|logvar concatenated, lane padded)
    b_ref:    [1,  NP] f32   (folded bias; exactly 0 in padded lanes)
    mask_ref: [1,  NP] f32   (1.0 on mu lanes [0, L), 0.0 elsewhere)
    out_ref:  [TB, NP] bf16
    acc_ref:  [TB, NP] f32   scratch accumulator (persists across K steps)
    """
    k = pl.program_id(1)

    @pl.when(k == 0)
    def _():
        acc_ref[...] = jnp.zeros_like(acc_ref)

    # f32 -> bf16 cast happens here: saves a whole wrapper-side pass over x in HBM.
    acc_ref[...] += jnp.dot(
        x_ref[...].astype(jnp.bfloat16), w_ref[...],
        preferred_element_type=jnp.float32)

    @pl.when(k == pl.num_programs(1) - 1)
    def _():
        mask = mask_ref[...]                                   # [1, NP]
        y = acc_ref[...] + b_ref[...]                          # [TB, NP] f32
        y2 = y * y
        mu_ss = jnp.sum(y2 * mask, axis=1, keepdims=True)      # [TB, 1]
        # logvar sum-of-squares = total - mu (padded lanes contribute exactly 0);
        # clamp >= 0 to guard against f32 cancellation producing a tiny negative.
        lv_ss = jnp.maximum(jnp.sum(y2, axis=1, keepdims=True) - mu_ss, 0.0)
        # x / max(||x||, eps)  ==  x * min(rsqrt(sum_sq), 1/eps)   (EUP rsqrt + mul)
        inv_mu = jnp.minimum(jax.lax.rsqrt(mu_ss), 1.0 / NORM_EPS)
        inv_lv = jnp.minimum(jax.lax.rsqrt(lv_ss), 1.0 / NORM_EPS)
        scale = inv_lv + mask * (inv_mu - inv_lv)              # per-lane blend
        out_ref[...] = (y * scale).astype(out_ref.dtype)


def encoder_forward(features, params, *, tb_max=1024, max_tk=None,
                    single_buffer_resident=True):
    """features: [B, feature_dim] f32. Returns (mu, logvar), each [B, latent_dim] f32."""
    B, F = features.shape
    L = params["w_mu"].shape[0]                 # PyTorch layout: [latent, feature]

    # ---- fold eval-mode BatchNorm into the linear layers (wrapper-side, f32) ----
    bn_scale = params["bn_gamma"] * jax.lax.rsqrt(params["bn_var"] + BN_EPS)   # [F]
    bn_shift = params["bn_beta"] - params["bn_mean"] * bn_scale                # [F]
    w_cat = jnp.concatenate([params["w_mu"].T, params["w_logvar"].T], axis=1)  # [F, 2L]
    b_cat = jnp.concatenate([params["b_mu"], params["b_logvar"]], axis=0)      # [2L]
    w_fold = bn_scale[:, None] * w_cat                                         # [F, 2L]
    b_fold = b_cat + bn_shift @ w_cat                                          # [2L]

    NP = max(128, _round_up(2 * L, 128))        # lane-dense output width
    out_bytes = 2                               # bf16 output writeback

    # ---- VMEM budget (leave headroom for Mosaic internal scratch/semaphores) ----
    try:
        vmem_cap = int(pltpu.get_tpu_info().vmem_capacity_bytes)
    except Exception:
        vmem_cap = 64 * 1024 * 1024             # conservative (v7x per-TC size)
    vmem_budget = max(vmem_cap - 12 * 1024 * 1024, (3 * vmem_cap) // 4)

    # ---- derive (tb, tk) from the VMEM budget ----
    small = 4 * (2 * NP * 4)                    # bias + mask blocks
    w_buf = 1 if single_buffer_resident else 2
    # per batch-row: x double-buffer (f32) + out double-buffer + acc scratch
    per_row = 2 * F * 4 + 2 * NP * out_bytes + NP * 4
    avail = vmem_budget - w_buf * F * NP * 2 - small
    full_k = (max_tk is None or max_tk >= F) and avail >= 16 * per_row
    if full_k:
        tk = F                                  # weights stay resident in VMEM
        tb = min(tb_max, avail // per_row)
    else:
        # K-reduction grid axis: stream (tk, NP) weight tiles, keep tiles VMEM-sized.
        tb = min(tb_max, 256)
        fixed = tb * NP * (2 * out_bytes + 4) + small
        tk = (vmem_budget - fixed) // (2 * NP * 2 + 2 * tb * 4)
        tk = max(128, (tk // 128) * 128)
        if max_tk is not None:
            tk = min(tk, max(128, (max_tk // 128) * 128))
        tk = min(tk, _round_up(F, 128))

    # batch tile: multiple of 16; keep >=2 grid programs when B allows it so the
    # "parallel" axis actually shards across v7x's two TensorCores.
    if B <= 16:
        tb = B
    else:
        tb = min(tb, _round_up(pl.cdiv(B, 2), 16))
        tb = max(16, (tb // 16) * 16)
        if tb >= B:
            tb = B

    nb = pl.cdiv(B, tb)
    nk = pl.cdiv(F, tk)
    F_pad = nk * tk

    # ---- operand prep (all f32; the x -> bf16 cast happens inside the kernel) ----
    x = features
    if F_pad != F:
        # Rare (K-split with F not a multiple of tk): zero-pad K so padded weight
        # rows / input cols contribute exactly zero to the accumulator.
        x = jnp.zeros((B, F_pad), features.dtype).at[:, :F].set(features)
    w_pad = (jnp.zeros((F_pad, NP), jnp.float32).at[:F, :2 * L].set(w_fold)
             .astype(jnp.bfloat16))                                            # [F_pad, NP]
    b_pad = jnp.zeros((1, NP), jnp.float32).at[:, :2 * L].set(b_fold)          # [1, NP]
    mu_mask = jnp.zeros((1, NP), jnp.float32).at[:, :L].set(1.0)               # [1, NP]

    def resident_spec(shape):
        # Constant index_map -> block never re-DMA'd; single-buffer it to halve VMEM.
        if single_buffer_resident:
            return pl.BlockSpec(shape, lambda i, k: (0, 0),
                                pipeline_mode=pl.Buffered(1))
        return pl.BlockSpec(shape, lambda i, k: (0, 0))

    if nk == 1:
        w_spec = resident_spec((F_pad, NP))
    else:
        w_spec = pl.BlockSpec((tk, NP), lambda i, k: (k, 0))   # streamed per K step

    out = pl.pallas_call(
        encoder_kernel,
        out_shape=jax.ShapeDtypeStruct((B, NP), jnp.bfloat16),
        grid_spec=pltpu.PrefetchScalarGridSpec(
            num_scalar_prefetch=0,
            grid=(nb, nk),
            in_specs=[
                pl.BlockSpec((tb, tk), lambda i, k: (i, k)),   # x (pipelined, f32)
                w_spec,                                        # weights (bf16)
                resident_spec((1, NP)),                        # folded bias
                resident_spec((1, NP)),                        # mu-lane mask
            ],
            out_specs=pl.BlockSpec((tb, NP), lambda i, k: (i, 0)),
            scratch_shapes=[pltpu.VMEM((tb, NP), jnp.float32)],
        ),
        compiler_params=pltpu.CompilerParams(
            dimension_semantics=("parallel", "arbitrary"),
            vmem_limit_bytes=int(vmem_budget),
        ),
        cost_estimate=pl.CostEstimate(
            flops=2 * B * F_pad * NP,
            transcendentals=2 * B,
            bytes_accessed=(B * F_pad * 4
                            + F_pad * NP * 2 * (1 if nk == 1 else nb)
                            + B * NP * out_bytes + 2 * NP * 4),
        ),
    )(x, w_pad, b_pad, mu_mask)

    mu = out[:, :L].astype(jnp.float32)
    logvar = out[:, L:2 * L].astype(jnp.float32)
    return mu, logvar


def init_params(key, feature_dim, latent_dim):
    """Deterministic parameter init mirroring Encoder.__init__ shapes."""
    k1, k2, k3, k4, k5, k6, k7, k8 = jax.random.split(key, 8)
    std = (2.0 / (feature_dim + latent_dim)) ** 0.5          # xavier_normal_
    b_bound = 1.0 / (feature_dim ** 0.5)                     # nn.Linear bias default
    return {
        "w_mu": std * jax.random.normal(k1, (latent_dim, feature_dim), jnp.float32),
        "b_mu": jax.random.uniform(k2, (latent_dim,), jnp.float32, -b_bound, b_bound),
        "w_logvar": std * jax.random.normal(k3, (latent_dim, feature_dim), jnp.float32),
        "b_logvar": jax.random.uniform(k4, (latent_dim,), jnp.float32, -b_bound, b_bound),
        # BN running stats / affine randomized so BN folding is exercised.
        "bn_gamma": 1.0 + 0.1 * jax.random.normal(k5, (feature_dim,), jnp.float32),
        "bn_beta": 0.1 * jax.random.normal(k6, (feature_dim,), jnp.float32),
        "bn_mean": 0.1 * jax.random.normal(k7, (feature_dim,), jnp.float32),
        "bn_var": 1.0 + 0.1 * jax.random.uniform(k8, (feature_dim,), jnp.float32),
    }


def encoder_reference(features, params):
    """Pure-JAX f32 reference of the same (eval-mode) forward pass."""
    x_ = ((features - params["bn_mean"]) / jnp.sqrt(params["bn_var"] + BN_EPS)
          * params["bn_gamma"] + params["bn_beta"])
    mu = x_ @ params["w_mu"].T + params["b_mu"]
    mu = mu / jnp.maximum(jnp.linalg.norm(mu, axis=1, keepdims=True), NORM_EPS)
    lv = x_ @ params["w_logvar"].T + params["b_logvar"]
    lv = lv / jnp.maximum(jnp.linalg.norm(lv, axis=1, keepdims=True), NORM_EPS)
    return mu, lv


if __name__ == "__main__":
    def run_case(B, F, L, seed, sb, max_tk=None):
        kx, kp = jax.random.split(jax.random.PRNGKey(seed))
        feats = jax.random.normal(kx, (B, F), jnp.float32)
        params = init_params(kp, F, L)
        fwd = jax.jit(functools.partial(
            encoder_forward, single_buffer_resident=sb, max_tk=max_tk))
        mu, lv = jax.block_until_ready(fwd(feats, params))
        mu_r, lv_r = encoder_reference(feats, params)
        assert mu.shape == (B, L) and lv.shape == (B, L)
        # bf16 matmul operands / bf16 output (f32 accumulate & epilogue) -> loose tol.
        assert jnp.allclose(mu, mu_r, atol=2e-2, rtol=2e-2), \
            float(jnp.max(jnp.abs(mu - mu_r)))
        assert jnp.allclose(lv, lv_r, atol=2e-2, rtol=2e-2), \
            float(jnp.max(jnp.abs(lv - lv_r)))

    # Case 1 (small): resident weights, single K tile.
    sb = True
    try:
        run_case(8, 32, 16, 0, sb)
    except Exception:
        # Fallback if this jax build rejects pl.Buffered(1) on resident blocks.
        sb = False
        run_case(8, 32, 16, 0, sb)

    # Case 2: ragged batch tiles (B=50, tb=32) + forced K-reduction axis (tk=256).
    run_case(50, 512, 64, 1, sb, max_tk=256)

    print("KERNEL_OK")
</pallas_src>

<mosaic_0001>
module attributes {stable_mosaic.version = 11 : i64} {
  func.func @encoder_kernel(%arg0: i32, %arg1: i32, %arg2: memref<8x32xf32, #tpu.memory_space<vmem>>, %arg3: memref<32x128xbf16, #tpu.memory_space<vmem>>, %arg4: memref<1x128xf32, #tpu.memory_space<vmem>>, %arg5: memref<1x128xf32, #tpu.memory_space<vmem>>, %arg6: memref<8x128xbf16, #tpu.memory_space<vmem>>, %arg7: memref<8x128xf32, #tpu.memory_space<vmem>>) attributes {dimension_semantics = [#tpu.dimension_semantics<parallel>, #tpu.dimension_semantics<arbitrary>], iteration_bounds = array<i64: 1, 1>, scalar_prefetch = 0 : i64, scratch_operands = 1 : i64, tpu.core_type = #tpu.core_type<tc>, window_params = [{transform_indices = @transform_0, window_bounds = array<i64: 8, 32>}, {pipeline_mode = #tpu.pipeline_mode<synchronous>, transform_indices = @transform_1, window_bounds = array<i64: 32, 128>}, {pipeline_mode = #tpu.pipeline_mode<synchronous>, transform_indices = @transform_2, window_bounds = array<i64: 1, 128>}, {pipeline_mode = #tpu.pipeline_mode<synchronous>, transform_indices = @transform_3, window_bounds = array<i64: 1, 128>}, {transform_indices = @transform_4, window_bounds = array<i64: 8, 128>}]} {
    %c0_i32 = arith.constant 0 : i32
    %0 = arith.cmpi eq, %arg1, %c0_i32 : i32
    %1 = arith.extui %0 : i1 to i32
    %c0_i32_0 = arith.constant 0 : i32
    %2 = arith.cmpi ne, %1, %c0_i32_0 : i32
    scf.if %2 {
      %cst_10 = arith.constant 0.000000e+00 : f32
      %13 = vector.broadcast %cst_10 : f32 to vector<8x128xf32>
      %c0_11 = arith.constant 0 : index
      %c0_12 = arith.constant 0 : index
      %14 = vector.load %arg7[%c0_11, %c0_12] : memref<8x128xf32, #tpu.memory_space<vmem>>, vector<8x128xf32>
      tpu.vector_store %arg7[%c0_11, %c0_12], %13 {strides = array<i32>} : memref<8x128xf32, #tpu.memory_space<vmem>>, vector<8x128xf32>,
    } else {
    }
    %c0 = arith.constant 0 : index
    %c0_1 = arith.constant 0 : index
    %3 = vector.load %arg7[%c0, %c0_1] : memref<8x128xf32, #tpu.memory_space<vmem>>, vector<8x128xf32>
    %c0_2 = arith.constant 0 : index
    %c0_3 = arith.constant 0 : index
    %4 = vector.load %arg2[%c0_2, %c0_3] : memref<8x32xf32, #tpu.memory_space<vmem>>, vector<8x32xf32>
    %5 = arith.truncf %4 : vector<8x32xf32> to vector<8x32xbf16>
    %c0_4 = arith.constant 0 : index
    %c0_5 = arith.constant 0 : index
    %6 = vector.load %arg3[%c0_4, %c0_5] : memref<32x128xbf16, #tpu.memory_space<vmem>>, vector<32x128xbf16>
    %cst = arith.constant dense<0.000000e+00> : vector<8x128xf32>
    %7 = tpu.matmul %5, %6, %cst {dimension_numbers = #tpu.dot_dimension_numbers<[1], [0], [0], [1], [0, 0, 1, 1], [], []>} : vector<8x32xbf16>, vector<32x128xbf16>, vector<8x128xf32> -> vector<8x128xf32>
    %8 = arith.addf %3, %7 : vector<8x128xf32>
    %c0_6 = arith.constant 0 : index
    %c0_7 = arith.constant 0 : index
    %9 = vector.load %arg7[%c0_6, %c0_7] : memref<8x128xf32, #tpu.memory_space<vmem>>, vector<8x128xf32>
    tpu.vector_store %arg7[%c0_6, %c0_7], %8 {strides = array<i32>} : memref<8x128xf32, #tpu.memory_space<vmem>>, vector<8x128xf32>,
    %c0_i32_8 = arith.constant 0 : i32
    %10 = arith.cmpi eq, %arg1, %c0_i32_8 : i32
    %11 = arith.extui %10 : i1 to i32
    %c0_i32_9 = arith.constant 0 : i32
    %12 = arith.cmpi ne, %11, %c0_i32_9 : i32
    scf.if %12 {
      %c0_10 = arith.constant 0 : index
      %c0_11 = arith.constant 0 : index
      %13 = vector.load %arg5[%c0_10, %c0_11] : memref<1x128xf32, #tpu.memory_space<vmem>>, vector<1x128xf32>
      %c0_12 = arith.constant 0 : index
      %c0_13 = arith.constant 0 : index
      %14 = vector.load %arg7[%c0_12, %c0_13] : memref<8x128xf32, #tpu.memory_space<vmem>>, vector<8x128xf32>
      %c0_14 = arith.constant 0 : index
      %c0_15 = arith.constant 0 : index
      %15 = vector.load %arg4[%c0_14, %c0_15] : memref<1x128xf32, #tpu.memory_space<vmem>>, vector<1x128xf32>
      %16 = vector.broadcast %15 : vector<1x128xf32> to vector<8x128xf32>
      %17 = arith.addf %14, %16 : vector<8x128xf32>
      %18 = arith.mulf %17, %17 : vector<8x128xf32>
      %19 = vector.broadcast %13 : vector<1x128xf32> to vector<8x128xf32>
      %20 = arith.mulf %18, %19 : vector<8x128xf32>
      %cst_16 = arith.constant dense<0.000000e+00> : vector<8xf32>
      %21 = vector.multi_reduction <add>, %20, %cst_16 [1] : vector<8x128xf32> to vector<8xf32>
      %22 = vector.shape_cast %21 : vector<8xf32> to vector<8x1xf32>
      %cst_17 = arith.constant dense<0.000000e+00> : vector<8xf32>
      %23 = vector.multi_reduction <add>, %18, %cst_17 [1] : vector<8x128xf32> to vector<8xf32>
      %24 = vector.shape_cast %23 : vector<8xf32> to vector<8x1xf32>
      %25 = arith.subf %24, %22 : vector<8x1xf32>
      %cst_18 = arith.constant 0.000000e+00 : f32
      %26 = vector.broadcast %cst_18 : f32 to vector<8x1xf32>
      %27 = arith.maximumf %25, %26 : vector<8x1xf32>
      %28 = math.rsqrt %22 : vector<8x1xf32>
      %cst_19 = arith.constant 1.000000e+10 : f32
      %29 = vector.broadcast %cst_19 : f32 to vector<8x1xf32>
      %30 = arith.minimumf %28, %29 : vector<8x1xf32>
      %31 = math.rsqrt %27 : vector<8x1xf32>
      %cst_20 = arith.constant 1.000000e+10 : f32
      %32 = vector.broadcast %cst_20 : f32 to vector<8x1xf32>
      %33 = arith.minimumf %31, %32 : vector<8x1xf32>
      %34 = arith.subf %30, %33 : vector<8x1xf32>
      %35 = vector.broadcast %13 : vector<1x128xf32> to vector<8x128xf32>
      %36 = vector.broadcast %34 : vector<8x1xf32> to vector<8x128xf32>
      %37 = arith.mulf %35, %36 : vector<8x128xf32>
      %38 = vector.broadcast %33 : vector<8x1xf32> to vector<8x128xf32>
      %39 = arith.addf %38, %37 : vector<8x128xf32>
      %40 = arith.mulf %17, %39 : vector<8x128xf32>
      %41 = arith.truncf %40 : vector<8x128xf32> to vector<8x128xbf16>
      %c0_21 = arith.constant 0 : index
      %c0_22 = arith.constant 0 : index
      %42 = vector.load %arg6[%c0_21, %c0_22] : memref<8x128xbf16, #tpu.memory_space<vmem>>, vector<8x128xbf16>
      tpu.vector_store %arg6[%c0_21, %c0_22], %41 {strides = array<i32>} : memref<8x128xbf16, #tpu.memory_space<vmem>>, vector<8x128xbf16>,
    } else {
    }
    return
  }
  func.func @transform_0(%arg0: i32, %arg1: i32) -> (i32, i32) {
    %c0_i32 = arith.constant 0 : i32
    return %arg0, %arg1 : i32, i32
  }
  func.func @transform_1(%arg0: i32, %arg1: i32) -> (i32, i32) {
    %c0_i32 = arith.constant 0 : i32
    %c0_i32_0 = arith.constant 0 : i32
    %c0_i32_1 = arith.constant 0 : i32
    return %c0_i32, %c0_i32_0 : i32, i32
  }
  func.func @transform_2(%arg0: i32, %arg1: i32) -> (i32, i32) {
    %c0_i32 = arith.constant 0 : i32
    %c0_i32_0 = arith.constant 0 : i32
    %c0_i32_1 = arith.constant 0 : i32
    return %c0_i32, %c0_i32_0 : i32, i32
  }
  func.func @transform_3(%arg0: i32, %arg1: i32) -> (i32, i32) {
    %c0_i32 = arith.constant 0 : i32
    %c0_i32_0 = arith.constant 0 : i32
    %c0_i32_1 = arith.constant 0 : i32
    return %c0_i32, %c0_i32_0 : i32, i32
  }
  func.func @transform_4(%arg0: i32, %arg1: i32) -> (i32, i32) {
    %c0_i32 = arith.constant 0 : i32
    %c0_i32_0 = arith.constant 0 : i32
    return %arg0, %c0_i32 : i32, i32
  }
}

module attributes {stable_mosaic.version = 11 : i64} {
  func.func @encoder_kernel(%arg0: i32, %arg1: i32, %arg2: memref<8x32xf32, #tpu.memory_space<vmem>>, %arg3: memref<32x128xbf16, #tpu.memory_space<vmem>>, %arg4: memref<1x128xf32, #tpu.memory_space<vmem>>, %arg5: memref<1x128xf32, #tpu.memory_space<vmem>>, %arg6: memref<8x128xbf16, #tpu.memory_space<vmem>>, %arg7: memref<8x128xf32, #tpu.memory_space<vmem>>) attributes {dimension_semantics = [#tpu.dimension_semantics<parallel>, #tpu.dimension_semantics<arbitrary>], iteration_bounds = array<i64: 1, 1>, scalar_prefetch = 0 : i64, scratch_operands = 1 : i64, tpu.core_type = #tpu.core_type<tc>, window_params = [{transform_indices = @transform_0, window_bounds = array<i64: 8, 32>}, {pipeline_mode = #tpu.pipeline_mode<synchronous>, transform_indices = @transform_1, window_bounds = array<i64: 32, 128>}, {pipeline_mode = #tpu.pipeline_mode<synchronous>, transform_indices = @transform_2, window_bounds = array<i64: 1, 128>}, {pipeline_mode = #tpu.pipeline_mode<synchronous>, transform_indices = @transform_3, window_bounds = array<i64: 1, 128>}, {transform_indices = @transform_4, window_bounds = array<i64: 8, 128>}]} {
    %c0_i32 = arith.constant 0 : i32
    %0 = arith.cmpi eq, %arg1, %c0_i32 : i32
    %1 = arith.extui %0 : i1 to i32
    %c0_i32_0 = arith.constant 0 : i32
    %2 = arith.cmpi ne, %1, %c0_i32_0 : i32
    scf.if %2 {
      %cst_10 = arith.constant 0.000000e+00 : f32
      %13 = vector.broadcast %cst_10 : f32 to vector<8x128xf32>
      %c0_11 = arith.constant 0 : index
      %c0_12 = arith.constant 0 : index
      %14 = vector.load %arg7[%c0_11, %c0_12] : memref<8x128xf32, #tpu.memory_space<vmem>>, vector<8x128xf32>
      tpu.vector_store %arg7[%c0_11, %c0_12], %13 {strides = array<i32>} : memref<8x128xf32, #tpu.memory_space<vmem>>, vector<8x128xf32>,
    } else {
    }
    %c0 = arith.constant 0 : index
    %c0_1 = arith.constant 0 : index
    %3 = vector.load %arg7[%c0, %c0_1] : memref<8x128xf32, #tpu.memory_space<vmem>>, vector<8x128xf32>
    %c0_2 = arith.constant 0 : index
    %c0_3 = arith.constant 0 : index
    %4 = vector.load %arg2[%c0_2, %c0_3] : memref<8x32xf32, #tpu.memory_space<vmem>>, vector<8x32xf32>
    %5 = arith.truncf %4 : vector<8x32xf32> to vector<8x32xbf16>
    %c0_4 = arith.constant 0 : index
    %c0_5 = arith.constant 0 : index
    %6 = vector.load %arg3[%c0_4, %c0_5] : memref<32x128xbf16, #tpu.memory_space<vmem>>, vector<32x128xbf16>
    %cst = arith.constant dense<0.000000e+00> : vector<8x128xf32>
    %7 = tpu.matmul %5, %6, %cst {dimension_numbers = #tpu.dot_dimension_numbers<[1], [0], [0], [1], [0, 0, 1, 1], [], []>} : vector<8x32xbf16>, vector<32x128xbf16>, vector<8x128xf32> -> vector<8x128xf32>
    %8 = arith.addf %3, %7 : vector<8x128xf32>
    %c0_6 = arith.constant 0 : index
    %c0_7 = arith.constant 0 : index
    %9 = vector.load %arg7[%c0_6, %c0_7] : memref<8x128xf32, #tpu.memory_space<vmem>>, vector<8x128xf32>
    tpu.vector_store %arg7[%c0_6, %c0_7], %8 {strides = array<i32>} : memref<8x128xf32, #tpu.memory_space<vmem>>, vector<8x128xf32>,
    %c0_i32_8 = arith.constant 0 : i32
    %10 = arith.cmpi eq, %arg1, %c0_i32_8 : i32
    %11 = arith.extui %10 : i1 to i32
    %c0_i32_9 = arith.constant 0 : i32
    %12 = arith.cmpi ne, %11, %c0_i32_9 : i32
    scf.if %12 {
      %c0_10 = arith.constant 0 : index
      %c0_11 = arith.constant 0 : index
      %13 = vector.load %arg5[%c0_10, %c0_11] : memref<1x128xf32, #tpu.memory_space<vmem>>, vector<1x128xf32>
      %c0_12 = arith.constant 0 : index
      %c0_13 = arith.constant 0 : index
      %14 = vector.load %arg7[%c0_12, %c0_13] : memref<8x128xf32, #tpu.memory_space<vmem>>, vector<8x128xf32>
      %c0_14 = arith.constant 0 : index
      %c0_15 = arith.constant 0 : index
      %15 = vector.load %arg4[%c0_14, %c0_15] : memref<1x128xf32, #tpu.memory_space<vmem>>, vector<1x128xf32>
      %16 = vector.broadcast %15 : vector<1x128xf32> to vector<8x128xf32>
      %17 = arith.addf %14, %16 : vector<8x128xf32>
      %18 = arith.mulf %17, %17 : vector<8x128xf32>
      %19 = vector.broadcast %13 : vector<1x128xf32> to vector<8x128xf32>
      %20 = arith.mulf %18, %19 : vector<8x128xf32>
      %cst_16 = arith.constant dense<0.000000e+00> : vector<8xf32>
      %21 = vector.multi_reduction <add>, %20, %cst_16 [1] : vector<8x128xf32> to vector<8xf32>
      %22 = vector.shape_cast %21 : vector<8xf32> to vector<8x1xf32>
      %cst_17 = arith.constant dense<0.000000e+00> : vector<8xf32>
      %23 = vector.multi_reduction <add>, %18, %cst_17 [1] : vector<8x128xf32> to vector<8xf32>
      %24 = vector.shape_cast %23 : vector<8xf32> to vector<8x1xf32>
      %25 = arith.subf %24, %22 : vector<8x1xf32>
      %cst_18 = arith.constant 0.000000e+00 : f32
      %26 = vector.broadcast %cst_18 : f32 to vector<8x1xf32>
      %27 = arith.maximumf %25, %26 : vector<8x1xf32>
      %28 = math.rsqrt %22 : vector<8x1xf32>
      %cst_19 = arith.constant 1.000000e+10 : f32
      %29 = vector.broadcast %cst_19 : f32 to vector<8x1xf32>
      %30 = arith.minimumf %28, %29 : vector<8x1xf32>
      %31 = math.rsqrt %27 : vector<8x1xf32>
      %cst_20 = arith.constant 1.000000e+10 : f32
      %32 = vector.broadcast %cst_20 : f32 to vector<8x1xf32>
      %33 = arith.minimumf %31, %32 : vector<8x1xf32>
      %34 = arith.subf %30, %33 : vector<8x1xf32>
      %35 = vector.broadcast %13 : vector<1x128xf32> to vector<8x128xf32>
      %36 = vector.broadcast %34 : vector<8x1xf32> to vector<8x128xf32>
      %37 = arith.mulf %35, %36 : vector<8x128xf32>
      %38 = vector.broadcast %33 : vector<8x1xf32> to vector<8x128xf32>
      %39 = arith.addf %38, %37 : vector<8x128xf32>
      %40 = arith.mulf %17, %39 : vector<8x128xf32>
      %41 = arith.truncf %40 : vector<8x128xf32> to vector<8x128xbf16>
      %c0_21 = arith.constant 0 : index
      %c0_22 = arith.constant 0 : index
      %42 = vector.load %arg6[%c0_21, %c0_22] : memref<8x128xbf16, #tpu.memory_space<vmem>>, vector<8x128xbf16>
      tpu.vector_store %arg6[%c0_21, %c0_22], %41 {strides = array<i32>} : memref<8x128xbf16, #tpu.memory_space<vmem>>, vector<8x128xbf16>,
    } else {
    }
    return
  }
  func.func @transform_0(%arg0: i32, %arg1: i32) -> (i32, i32) {
    %c0_i32 = arith.constant 0 : i32
    return %arg0, %arg1 : i32, i32
  }
  func.func @transform_1(%arg0: i32, %arg1: i32) -> (i32, i32) {
    %c0_i32 = arith.constant 0 : i32
    %c0_i32_0 = arith.constant 0 : i32
    %c0_i32_1 = arith.constant 0 : i32
    return %c0_i32, %c0_i32_0 : i32, i32
  }
  func.func @transform_2(%arg0: i32, %arg1: i32) -> (i32, i32) {
    %c0_i32 = arith.constant 0 : i32
    %c0_i32_0 = arith.constant 0 : i32
    %c0_i32_1 = arith.constant 0 : i32
    return %c0_i32, %c0_i32_0 : i32, i32
  }
  func.func @transform_3(%arg0: i32, %arg1: i32) -> (i32, i32) {
    %c0_i32 = arith.constant 0 : i32
    %c0_i32_0 = arith.constant 0 : i32
    %c0_i32_1 = arith.constant 0 : i32
    return %c0_i32, %c0_i32_0 : i32, i32
  }
  func.func @transform_4(%arg0: i32, %arg1: i32) -> (i32, i32) {
    %c0_i32 = arith.constant 0 : i32
    %c0_i32_0 = arith.constant 0 : i32
    return %arg0, %c0_i32 : i32, i32
  }
}

</mosaic_0001>

<bundles_post_ra>
// kernel: encoder_forward.1
= control target key start
LH: loop header
LB: loop body
LE: loop exit
PB: predicated region body
PF: predicated region fallthrough
CT: control target
= control target key end

     0   :  { %v153_v0 = vmov 0.0   ;;  %vm154_vm0 = vmmov 0   ;;  %vm42_vm1 = vcmask 261120   ;;  %s198_s1 = inlined_call_operand.vmem [shape: bf16[32,128], index: 1, kind: input, shape index: {}]   ;;  %s199_s0 = inlined_call_operand.vmem [shape: f32[8,32], index: 0, kind: input, shape index: {}]   ;;  %s200_s2 = inlined_call_operand.vmem [shape: f32[1,128], index: 2, kind: input, shape index: {}]   ;;  %s201_s3 = inlined_call_operand.vmem [shape: f32[1,128], index: 3, kind: input, shape index: {}]   ;;  %s202_s4 = inlined_call_operand.vmem [shape: bf16[8,128], index: 4, kind: output, shape index: {}]  }
   0x1   :  { %137 = vmatprep.subr.bf16.mxu0 %v153_v0  ;;  %v147_v1 = vld [vmem:[%s198_s1] sm:$0xff]   ;;  %141 = vmatprep.mubr.msk.bf16.mxu0 %vm154_vm0, %v153_v0  ;;  %v148_v2 = vld [vmem:[%s198_s1 + $0x8] sm:$0xff]  }
   0x2   :  { %138 = vmatpush3.bf16.msra.mxu0 %v147_v1  ;;  %v24_v3 = vld [vmem:[%s199_s0] sm:$0xff] }
   0x3   :  { %139 = vmatprep.subr.bf16.mxu0 %v153_v0  ;;  %v25_v4 = vpack.c.bf16 %v24_v3, %v24_v3  ;;  %v132_v5 = vld [vmem:[%s200_s2] ss:$0 sm:$0xff] }
   0x4   :  { %v133_v10 = vld [vmem:[%s201_s3] ss:$0 sm:$0xff] }
   0x6   :  { %140 = vmatpush3.bf16.msra.mxu0 %v148_v2 }
   0x9   :  { %142 = vmatmul.mubr.msk.bf16.vlgmr.msra.gmra.mrb[0].mxu0 %vm42_vm1, %v25_v4 }
  0xdc   :  { %v80_v6 = vpop.f32.mrb[0].mxu0 }
  0xdd   :  { %v100_v7 = vadd.f32 %v132_v5, %v80_v6  ;;  %v143_v8 = vpop.f32.mrb[1].mxu0 }
  0xde   :  { %v83_v9 = vpop.f32.mrb[2].mxu0 }
  0xdf   :  { %v144_v11 = vpop.f32.mrb[3].mxu0  ;;  %v101_v12 = vmul.f32 %v100_v7, %v100_v7 }
  0xe1   :  { %v108_v13 = vmul.f32 %v133_v10, %v101_v12 }
  0xe3   :  { %109 = vadd.xlane.f32.xlu0 %v108_v13 }
  0xe7   :  { %111 = vadd.xlane.f32.xlu0 %v101_v12 }
 0x170   :  { %v110_v14 = vpop.xlane.xlu0 %109 }
 0x171   :  { %149 = vrsqrt.f32 %v110_v14 }
 0x174   :  { %v112_v15 = vpop.xlane.xlu0 %111 }
 0x175   :  { %v113_v16 = vsub.f32 %v112_v15, %v110_v14 }
 0x177   :  { %v114_v17 = vmax.f32 %v113_v16, 0.0 }
 0x179   :  { %151 = vrsqrt.f32 %v114_v17 }
 0x17b   :  { %v150_v18 = vpop.eup %149 }
 0x17c   :  { %v116_v20 = vmin.f32 %v150_v18, 1e+10 }
 0x183   :  { %v152_v19 = vpop.eup %151 }
 0x184   :  { %v118_v21 = vmin.f32 %v152_v19, 1e+10 }
 0x186   :  { %v119_v22 = vsub.f32 %v116_v20, %v118_v21 }
 0x188   :  { %v120_v23 = vmul.f32 %v133_v10, %v119_v22 }
 0x18a   :  { %v121_v24 = vadd.f32 %v120_v23, %v118_v21 }
 0x18c   :  { %v122_v25 = vmul.f32 %v121_v24, %v100_v7 }
 0x18e   :  { %v123_v26 = vpack.c.bf16 %v122_v25, %v122_v25 }
 0x190   :  { %124 = vst [vmem:[%s202_s4] sm:$0xf] %v123_v26 }

// kernel: encoder_forward.1
= control target key start
LH: loop header
LB: loop body
LE: loop exit
PB: predicated region body
PF: predicated region fallthrough
CT: control target
= control target key end

     0   :  { %v153_v0 = vmov 0.0   ;;  %vm154_vm0 = vmmov 0   ;;  %vm42_vm1 = vcmask 261120   ;;  %s198_s1 = inlined_call_operand.vmem [shape: bf16[32,128], index: 1, kind: input, shape index: {}]   ;;  %s199_s0 = inlined_call_operand.vmem [shape: f32[8,32], index: 0, kind: input, shape index: {}]   ;;  %s200_s2 = inlined_call_operand.vmem [shape: f32[1,128], index: 2, kind: input, shape index: {}]   ;;  %s201_s3 = inlined_call_operand.vmem [shape: f32[1,128], index: 3, kind: input, shape index: {}]   ;;  %s202_s4 = inlined_call_operand.vmem [shape: bf16[8,128], index: 4, kind: output, shape index: {}]  }
   0x1   :  { %137 = vmatprep.subr.bf16.mxu0 %v153_v0  ;;  %v147_v1 = vld [vmem:[%s198_s1] sm:$0xff]   ;;  %141 = vmatprep.mubr.msk.bf16.mxu0 %vm154_vm0, %v153_v0  ;;  %v148_v2 = vld [vmem:[%s198_s1 + $0x8] sm:$0xff]  }
   0x2   :  { %138 = vmatpush3.bf16.msra.mxu0 %v147_v1  ;;  %v24_v3 = vld [vmem:[%s199_s0] sm:$0xff] }
   0x3   :  { %139 = vmatprep.subr.bf16.mxu0 %v153_v0  ;;  %v25_v4 = vpack.c.bf16 %v24_v3, %v24_v3  ;;  %v132_v5 = vld [vmem:[%s200_s2] ss:$0 sm:$0xff] }
   0x4   :  { %v133_v10 = vld [vmem:[%s201_s3] ss:$0 sm:$0xff] }
   0x6   :  { %140 = vmatpush3.bf16.msra.mxu0 %v148_v2 }
   0x9   :  { %142 = vmatmul.mubr.msk.bf16.vlgmr.msra.gmra.mrb[0].mxu0 %vm42_vm1, %v25_v4 }
  0xdc   :  { %v80_v6 = vpop.f32.mrb[0].mxu0 }
  0xdd   :  { %v100_v7 = vadd.f32 %v132_v5, %v80_v6  ;;  %v143_v8 = vpop.f32.mrb[1].mxu0 }
  0xde   :  { %v83_v9 = vpop.f32.mrb[2].mxu0 }
  0xdf   :  { %v144_v11 = vpop.f32.mrb[3].mxu0  ;;  %v101_v12 = vmul.f32 %v100_v7, %v100_v7 }
  0xe1   :  { %v108_v13 = vmul.f32 %v133_v10, %v101_v12 }
  0xe3   :  { %109 = vadd.xlane.f32.xlu0 %v108_v13 }
  0xe7   :  { %111 = vadd.xlane.f32.xlu0 %v101_v12 }
 0x170   :  { %v110_v14 = vpop.xlane.xlu0 %109 }
 0x171   :  { %149 = vrsqrt.f32 %v110_v14 }
 0x174   :  { %v112_v15 = vpop.xlane.xlu0 %111 }
 0x175   :  { %v113_v16 = vsub.f32 %v112_v15, %v110_v14 }
 0x177   :  { %v114_v17 = vmax.f32 %v113_v16, 0.0 }
 0x179   :  { %151 = vrsqrt.f32 %v114_v17 }
 0x17b   :  { %v150_v18 = vpop.eup %149 }
 0x17c   :  { %v116_v20 = vmin.f32 %v150_v18, 1e+10 }
 0x183   :  { %v152_v19 = vpop.eup %151 }
 0x184   :  { %v118_v21 = vmin.f32 %v152_v19, 1e+10 }
 0x186   :  { %v119_v22 = vsub.f32 %v116_v20, %v118_v21 }
 0x188   :  { %v120_v23 = vmul.f32 %v133_v10, %v119_v22 }
 0x18a   :  { %v121_v24 = vadd.f32 %v120_v23, %v118_v21 }
 0x18c   :  { %v122_v25 = vmul.f32 %v121_v24, %v100_v7 }
 0x18e   :  { %v123_v26 = vpack.c.bf16 %v122_v25, %v122_v25 }
 0x190   :  { %124 = vst [vmem:[%s202_s4] sm:$0xf] %v123_v26 }

</bundles_post_ra>
